<compile_context>
chip_gen: v6e
topology: v6e:2x2x1
jax: 0.10.0
libtpu: 0.0.40
codegen_flags: <defaults>
</compile_context>

<pallas_src>
import functools

import jax
import jax.numpy as jnp
from jax.experimental import pallas as pl
from jax.experimental.pallas import tpu as pltpu


def _round_up(n, m):
    return ((n + m - 1) // m) * m


def _mlp_kernel(x_ref, w1_ref, b1_ref, w2_ref, b2_ref, w3_ref, b3_ref,
                w4_ref, b4_ref, o_ref):
    # fc1 + relu: bf16 MXU dot, f32 accumulate, f32 bias/relu, bf16 boundary.
    h = jnp.dot(x_ref[...], w1_ref[...], preferred_element_type=jnp.float32)
    h = jnp.maximum(h + b1_ref[...], 0.0).astype(jnp.bfloat16)
    # fc2 + relu
    h = jnp.dot(h, w2_ref[...], preferred_element_type=jnp.float32)
    h = jnp.maximum(h + b2_ref[...], 0.0).astype(jnp.bfloat16)
    # fc3 + relu
    h = jnp.dot(h, w3_ref[...], preferred_element_type=jnp.float32)
    h = jnp.maximum(h + b3_ref[...], 0.0).astype(jnp.bfloat16)        # (TB, 32)
    # fc4 as a transposed-RHS matmul (contract h's last dim) -> lane-dense row.
    # w4 is padded to 8 rows (row 0 real, rest zero) so M is sublane-aligned.
    rows = jax.lax.dot_general(
        w4_ref[...], h,
        dimension_numbers=(((1,), (1,)), ((), ())),
        preferred_element_type=jnp.float32)                            # (8, TB)
    tb = o_ref.shape[-1]
    o_ref[...] = (rows[0:1] + b4_ref[...]).reshape(1, 1, tb)


def prepare_params(params, input_size):
    """Pad / cast the f32 transposed params into the kernel's layout."""
    f_pad = _round_up(input_size, 16)   # bf16 sublane packing for fc1's K dim
    w1 = jnp.zeros((f_pad, 512), jnp.float32).at[:input_size].set(params["w1"])
    w4 = jnp.zeros((8, 32), jnp.float32).at[0].set(params["w4"].reshape(32))
    return {
        "w1": w1.astype(jnp.bfloat16),            # (f_pad, 512)
        "b1": params["b1"],                       # (1, 512) f32
        "w2": params["w2"].astype(jnp.bfloat16),  # (512, 128)
        "b2": params["b2"],                       # (1, 128) f32
        "w3": params["w3"].astype(jnp.bfloat16),  # (128, 32)
        "b3": params["b3"],                       # (1, 32) f32
        "w4": w4.astype(jnp.bfloat16),            # (8, 32), row 0 real
        "b4": params["b4"],                       # (1, 1) f32
    }


def _pick_batch_tile(batch):
    tb = _round_up(batch, 8)
    if tb > 1024:
        return 1024
    if tb >= 256:
        # >=2 grid steps so v7x's second TensorCore gets work; keep the tile a
        # multiple of 128 so every block stays lane/sublane aligned.
        return _round_up(-(-tb // 2), 128)
    return tb


@functools.partial(jax.jit, static_argnames=("input_size",))
def value_network_forward(x, kparams, input_size):
    """x: [B, input_size] float32. Returns [B, 1] float32."""
    B = x.shape[0]
    F_PAD = kparams["w1"].shape[0]

    TB = _pick_batch_tile(B)
    B_pad = _round_up(B, TB)
    num_tiles = B_pad // TB

    # bf16 x, padded only to (B_pad, F_PAD): tiny copy, ~21x less DMA than the
    # previous f32 pad-to-128 version.
    x_pad = jnp.zeros((B_pad, F_PAD), jnp.bfloat16)
    x_pad = x_pad.at[:B, :input_size].set(x.astype(jnp.bfloat16))

    w1, b1 = kparams["w1"], kparams["b1"]
    w2, b2 = kparams["w2"], kparams["b2"]
    w3, b3 = kparams["w3"], kparams["b3"]
    w4, b4 = kparams["w4"], kparams["b4"]

    # Weights/biases: constant index_map -> stay VMEM-resident across steps.
    const = lambda a: pl.BlockSpec(a.shape, lambda i: (0,) * a.ndim)

    out = pl.pallas_call(
        _mlp_kernel,
        out_shape=jax.ShapeDtypeStruct((num_tiles, 1, TB), jnp.float32),
        grid=(num_tiles,),
        in_specs=[
            pl.BlockSpec((TB, F_PAD), lambda i: (i, 0)),   # x tile (pipelined)
            const(w1), const(b1),
            const(w2), const(b2),
            const(w3), const(b3),
            const(w4), const(b4),
        ],
        out_specs=pl.BlockSpec((1, 1, TB), lambda i: (i, 0, 0)),  # lane-dense
        compiler_params=pltpu.CompilerParams(
            dimension_semantics=("parallel",)),   # v7x: shard batch over 2 TCs
    )(x_pad, w1, b1, w2, b2, w3, b3, w4, b4)

    # (num_tiles, 1, TB) -> (B, 1)
    return out.reshape(B_pad)[:B].reshape(B, 1)


def init_params(key, input_size):
    """Deterministic init matching the PyTorch module's init scheme.

    fc1-3 weights: kaiming normal (relu)  -> std = sqrt(2 / fan_in)
    fc4 weight   : xavier normal          -> std = sqrt(2 / (fan_in + fan_out))
    biases       : PyTorch Linear default -> U(-1/sqrt(fan_in), 1/sqrt(fan_in))
    Weights are stored transposed: [in_features, out_features], f32.
    """
    sizes = [(input_size, 512), (512, 128), (128, 32), (32, 1)]
    keys = jax.random.split(key, 8)
    params = {}
    for i, (fan_in, fan_out) in enumerate(sizes):
        wk, bk = keys[2 * i], keys[2 * i + 1]
        if i < 3:
            std = (2.0 / fan_in) ** 0.5              # kaiming normal, relu gain
        else:
            std = (2.0 / (fan_in + fan_out)) ** 0.5  # xavier normal
        w = std * jax.random.normal(wk, (fan_in, fan_out), dtype=jnp.float32)
        bound = 1.0 / (fan_in ** 0.5)
        b = jax.random.uniform(bk, (1, fan_out), dtype=jnp.float32,
                               minval=-bound, maxval=bound)
        params[f"w{i+1}"] = w
        params[f"b{i+1}"] = b
    return params


def reference_forward_matched(x, kparams, input_size):
    """Reference using the kernel's exact bf16-boundary numerics."""
    f_pad = kparams["w1"].shape[0]
    xp = jnp.zeros((x.shape[0], f_pad), jnp.bfloat16)
    xp = xp.at[:, :input_size].set(x.astype(jnp.bfloat16))
    h = jnp.dot(xp, kparams["w1"], preferred_element_type=jnp.float32)
    h = jnp.maximum(h + kparams["b1"], 0.0).astype(jnp.bfloat16)
    h = jnp.dot(h, kparams["w2"], preferred_element_type=jnp.float32)
    h = jnp.maximum(h + kparams["b2"], 0.0).astype(jnp.bfloat16)
    h = jnp.dot(h, kparams["w3"], preferred_element_type=jnp.float32)
    h = jnp.maximum(h + kparams["b3"], 0.0).astype(jnp.bfloat16)
    out = jax.lax.dot_general(kparams["w4"][0:1], h,
                              dimension_numbers=(((1,), (1,)), ((), ())),
                              preferred_element_type=jnp.float32)    # (1, B)
    return out.reshape(-1, 1) + kparams["b4"]


def reference_forward_f32(x, params):
    """Pure-f32 reference of the original PyTorch forward."""
    h = jnp.maximum(x @ params["w1"] + params["b1"], 0.0)
    h = jnp.maximum(h @ params["w2"] + params["b2"], 0.0)
    h = jnp.maximum(h @ params["w3"] + params["b3"], 0.0)
    return h @ params["w4"] + params["b4"]


if __name__ == "__main__":
    key = jax.random.PRNGKey(0)
    k_params, k_x = jax.random.split(key)

    INPUT_SIZE = 12   # flappy-bird observation size
    params = init_params(k_params, INPUT_SIZE)
    kparams = prepare_params(params, INPUT_SIZE)

    # batch=8 exercises the single-tile path; batch=384 exercises the
    # multi-tile (grid=2) + batch-padding + lane-dense multi-block output path.
    for batch in (8, 384):
        xk = jax.random.fold_in(k_x, batch)
        x = jax.random.normal(xk, (batch, INPUT_SIZE), dtype=jnp.float32)

        out = value_network_forward(x, kparams, INPUT_SIZE)
        out = jax.block_until_ready(out)
        assert out.shape == (batch, 1), out.shape

        # Tight check against a reference with identical bf16 numerics.
        ref_bf16 = reference_forward_matched(x, kparams, INPUT_SIZE)
        assert jnp.allclose(out, ref_bf16, atol=2e-3, rtol=2e-3), (
            batch, float(jnp.max(jnp.abs(out - ref_bf16))))

        # Loose check against the full-f32 PyTorch-semantics reference.
        ref_f32 = reference_forward_f32(x, params)
        assert jnp.allclose(out, ref_f32, atol=1e-1, rtol=5e-2), (
            batch, float(jnp.max(jnp.abs(out - ref_f32))))

    print("KERNEL_OK")
</pallas_src>

<mosaic_0001>
module attributes {stable_mosaic.version = 11 : i64} {
  func.func @_mlp_kernel(%arg0: i32, %arg1: memref<8x16xbf16, #tpu.memory_space<vmem>>, %arg2: memref<16x512xbf16, #tpu.memory_space<vmem>>, %arg3: memref<1x512xf32, #tpu.memory_space<vmem>>, %arg4: memref<512x128xbf16, #tpu.memory_space<vmem>>, %arg5: memref<1x128xf32, #tpu.memory_space<vmem>>, %arg6: memref<128x32xbf16, #tpu.memory_space<vmem>>, %arg7: memref<1x32xf32, #tpu.memory_space<vmem>>, %arg8: memref<8x32xbf16, #tpu.memory_space<vmem>>, %arg9: memref<1x1xf32, #tpu.memory_space<vmem>>, %arg10: memref<1x1x8xf32, #tpu.memory_space<vmem>>) attributes {dimension_semantics = [#tpu.dimension_semantics<parallel>], iteration_bounds = array<i64: 1>, scalar_prefetch = 0 : i64, scratch_operands = 0 : i64, tpu.core_type = #tpu.core_type<tc>, window_params = [{transform_indices = @transform_0, window_bounds = array<i64: 8, 16>}, {pipeline_mode = #tpu.pipeline_mode<synchronous>, transform_indices = @transform_1, window_bounds = array<i64: 16, 512>}, {pipeline_mode = #tpu.pipeline_mode<synchronous>, transform_indices = @transform_2, window_bounds = array<i64: 1, 512>}, {pipeline_mode = #tpu.pipeline_mode<synchronous>, transform_indices = @transform_3, window_bounds = array<i64: 512, 128>}, {pipeline_mode = #tpu.pipeline_mode<synchronous>, transform_indices = @transform_4, window_bounds = array<i64: 1, 128>}, {pipeline_mode = #tpu.pipeline_mode<synchronous>, transform_indices = @transform_5, window_bounds = array<i64: 128, 32>}, {pipeline_mode = #tpu.pipeline_mode<synchronous>, transform_indices = @transform_6, window_bounds = array<i64: 1, 32>}, {pipeline_mode = #tpu.pipeline_mode<synchronous>, transform_indices = @transform_7, window_bounds = array<i64: 8, 32>}, {pipeline_mode = #tpu.pipeline_mode<synchronous>, transform_indices = @transform_8, window_bounds = array<i64: 1, 1>}, {transform_indices = @transform_9, window_bounds = array<i64: 1, 1, 8>}]} {
    %c0 = arith.constant 0 : index
    %c0_0 = arith.constant 0 : index
    %0 = vector.load %arg1[%c0, %c0_0] : memref<8x16xbf16, #tpu.memory_space<vmem>>, vector<8x16xbf16>
    %c0_1 = arith.constant 0 : index
    %c0_2 = arith.constant 0 : index
    %1 = vector.load %arg2[%c0_1, %c0_2] : memref<16x512xbf16, #tpu.memory_space<vmem>>, vector<16x512xbf16>
    %cst = arith.constant dense<0.000000e+00> : vector<8x512xf32>
    %2 = tpu.matmul %0, %1, %cst {dimension_numbers = #tpu.dot_dimension_numbers<[1], [0], [0], [1], [0, 0, 1, 1], [], []>} : vector<8x16xbf16>, vector<16x512xbf16>, vector<8x512xf32> -> vector<8x512xf32>
    %c0_3 = arith.constant 0 : index
    %c0_4 = arith.constant 0 : index
    %3 = vector.load %arg3[%c0_3, %c0_4] : memref<1x512xf32, #tpu.memory_space<vmem>>, vector<1x512xf32>
    %4 = vector.broadcast %3 : vector<1x512xf32> to vector<8x512xf32>
    %5 = arith.addf %2, %4 : vector<8x512xf32>
    %cst_5 = arith.constant 0.000000e+00 : f32
    %6 = vector.broadcast %cst_5 : f32 to vector<8x512xf32>
    %7 = arith.maximumf %5, %6 : vector<8x512xf32>
    %8 = arith.truncf %7 : vector<8x512xf32> to vector<8x512xbf16>
    %c0_6 = arith.constant 0 : index
    %c0_7 = arith.constant 0 : index
    %9 = vector.load %arg4[%c0_6, %c0_7] : memref<512x128xbf16, #tpu.memory_space<vmem>>, vector<512x128xbf16>
    %cst_8 = arith.constant dense<0.000000e+00> : vector<8x128xf32>
    %10 = tpu.matmul %8, %9, %cst_8 {dimension_numbers = #tpu.dot_dimension_numbers<[1], [0], [0], [1], [0, 0, 1, 1], [], []>} : vector<8x512xbf16>, vector<512x128xbf16>, vector<8x128xf32> -> vector<8x128xf32>
    %c0_9 = arith.constant 0 : index
    %c0_10 = arith.constant 0 : index
    %11 = vector.load %arg5[%c0_9, %c0_10] : memref<1x128xf32, #tpu.memory_space<vmem>>, vector<1x128xf32>
    %12 = vector.broadcast %11 : vector<1x128xf32> to vector<8x128xf32>
    %13 = arith.addf %10, %12 : vector<8x128xf32>
    %cst_11 = arith.constant 0.000000e+00 : f32
    %14 = vector.broadcast %cst_11 : f32 to vector<8x128xf32>
    %15 = arith.maximumf %13, %14 : vector<8x128xf32>
    %16 = arith.truncf %15 : vector<8x128xf32> to vector<8x128xbf16>
    %c0_12 = arith.constant 0 : index
    %c0_13 = arith.constant 0 : index
    %17 = vector.load %arg6[%c0_12, %c0_13] : memref<128x32xbf16, #tpu.memory_space<vmem>>, vector<128x32xbf16>
    %cst_14 = arith.constant dense<0.000000e+00> : vector<8x32xf32>
    %18 = tpu.matmul %16, %17, %cst_14 {dimension_numbers = #tpu.dot_dimension_numbers<[1], [0], [0], [1], [0, 0, 1, 1], [], []>} : vector<8x128xbf16>, vector<128x32xbf16>, vector<8x32xf32> -> vector<8x32xf32>
    %c0_15 = arith.constant 0 : index
    %c0_16 = arith.constant 0 : index
    %19 = vector.load %arg7[%c0_15, %c0_16] : memref<1x32xf32, #tpu.memory_space<vmem>>, vector<1x32xf32>
    %20 = vector.broadcast %19 : vector<1x32xf32> to vector<8x32xf32>
    %21 = arith.addf %18, %20 : vector<8x32xf32>
    %cst_17 = arith.constant 0.000000e+00 : f32
    %22 = vector.broadcast %cst_17 : f32 to vector<8x32xf32>
    %23 = arith.maximumf %21, %22 : vector<8x32xf32>
    %24 = arith.truncf %23 : vector<8x32xf32> to vector<8x32xbf16>
    %c0_18 = arith.constant 0 : index
    %c0_19 = arith.constant 0 : index
    %25 = vector.load %arg8[%c0_18, %c0_19] : memref<8x32xbf16, #tpu.memory_space<vmem>>, vector<8x32xbf16>
    %cst_20 = arith.constant dense<0.000000e+00> : vector<8x8xf32>
    %26 = tpu.matmul %25, %24, %cst_20 {dimension_numbers = #tpu.dot_dimension_numbers<[1], [1], [0], [0], [0, 0, 1, 0], [], []>} : vector<8x32xbf16>, vector<8x32xbf16>, vector<8x8xf32> -> vector<8x8xf32>
    %27 = vector.extract_strided_slice %26 {offsets = [0, 0], sizes = [1, 8], strides = [1, 1]} : vector<8x8xf32> to vector<1x8xf32>
    %c0_21 = arith.constant 0 : index
    %c0_22 = arith.constant 0 : index
    %28 = vector.load %arg9[%c0_21, %c0_22] : memref<1x1xf32, #tpu.memory_space<vmem>>, vector<1x1xf32>
    %29 = vector.broadcast %28 : vector<1x1xf32> to vector<1x8xf32>
    %30 = arith.addf %27, %29 : vector<1x8xf32>
    %31 = vector.shape_cast %30 : vector<1x8xf32> to vector<1x1x8xf32>
    %c0_23 = arith.constant 0 : index
    %c0_24 = arith.constant 0 : index
    %c0_25 = arith.constant 0 : index
    %32 = vector.load %arg10[%c0_23, %c0_24, %c0_25] : memref<1x1x8xf32, #tpu.memory_space<vmem>>, vector<1x1x8xf32>
    tpu.vector_store %arg10[%c0_23, %c0_24, %c0_25], %31 {strides = array<i32>} : memref<1x1x8xf32, #tpu.memory_space<vmem>>, vector<1x1x8xf32>,
    return
  }
  func.func @transform_0(%arg0: i32) -> (i32, i32) {
    %c0_i32 = arith.constant 0 : i32
    %c0_i32_0 = arith.constant 0 : i32
    return %arg0, %c0_i32 : i32, i32
  }
  func.func @transform_1(%arg0: i32) -> (i32, i32) {
    %c0_i32 = arith.constant 0 : i32
    %c0_i32_0 = arith.constant 0 : i32
    %c0_i32_1 = arith.constant 0 : i32
    return %c0_i32, %c0_i32_0 : i32, i32
  }
  func.func @transform_2(%arg0: i32) -> (i32, i32) {
    %c0_i32 = arith.constant 0 : i32
    %c0_i32_0 = arith.constant 0 : i32
    %c0_i32_1 = arith.constant 0 : i32
    return %c0_i32, %c0_i32_0 : i32, i32
  }
  func.func @transform_3(%arg0: i32) -> (i32, i32) {
    %c0_i32 = arith.constant 0 : i32
    %c0_i32_0 = arith.constant 0 : i32
    %c0_i32_1 = arith.constant 0 : i32
    return %c0_i32, %c0_i32_0 : i32, i32
  }
  func.func @transform_4(%arg0: i32) -> (i32, i32) {
    %c0_i32 = arith.constant 0 : i32
    %c0_i32_0 = arith.constant 0 : i32
    %c0_i32_1 = arith.constant 0 : i32
    return %c0_i32, %c0_i32_0 : i32, i32
  }
  func.func @transform_5(%arg0: i32) -> (i32, i32) {
    %c0_i32 = arith.constant 0 : i32
    %c0_i32_0 = arith.constant 0 : i32
    %c0_i32_1 = arith.constant 0 : i32
    return %c0_i32, %c0_i32_0 : i32, i32
  }
  func.func @transform_6(%arg0: i32) -> (i32, i32) {
    %c0_i32 = arith.constant 0 : i32
    %c0_i32_0 = arith.constant 0 : i32
    %c0_i32_1 = arith.constant 0 : i32
    return %c0_i32, %c0_i32_0 : i32, i32
  }
  func.func @transform_7(%arg0: i32) -> (i32, i32) {
    %c0_i32 = arith.constant 0 : i32
    %c0_i32_0 = arith.constant 0 : i32
    %c0_i32_1 = arith.constant 0 : i32
    return %c0_i32, %c0_i32_0 : i32, i32
  }
  func.func @transform_8(%arg0: i32) -> (i32, i32) {
    %c0_i32 = arith.constant 0 : i32
    %c0_i32_0 = arith.constant 0 : i32
    %c0_i32_1 = arith.constant 0 : i32
    return %c0_i32, %c0_i32_0 : i32, i32
  }
  func.func @transform_9(%arg0: i32) -> (i32, i32, i32) {
    %c0_i32 = arith.constant 0 : i32
    %c0_i32_0 = arith.constant 0 : i32
    %c0_i32_1 = arith.constant 0 : i32
    return %arg0, %c0_i32, %c0_i32_0 : i32, i32, i32
  }
}

</mosaic_0001>

<bundles_post_ra>
// kernel: value_network_forward.1
= control target key start
LH: loop header
LB: loop body
LE: loop exit
PB: predicated region body
PF: predicated region fallthrough
CT: control target
= control target key end

     0   :  { %s1093_s0 = inlined_call_operand.vmem [shape: bf16[8,16], index: 0, kind: input, shape index: {}]   ;;  %s1094_s1 = inlined_call_operand.vmem [shape: bf16[16,512], index: 1, kind: input, shape index: {}]   ;;  %s1095_s2 = inlined_call_operand.vmem [shape: f32[1,512], index: 2, kind: input, shape index: {}]   ;;  %s1096_s3 = inlined_call_operand.hbm [shape: bf16[512,128], index: 3, kind: input, shape index: {}]   ;;  %s1097_s4 = inlined_call_operand.vmem [shape: f32[1,128], index: 4, kind: input, shape index: {}]   ;;  %s1098_s5 = inlined_call_operand.vmem [shape: bf16[128,32], index: 5, kind: input, shape index: {}]   ;;  %s1099_s6 = inlined_call_operand.vmem [shape: f32[1,32], index: 6, kind: input, shape index: {}]   ;;  %s1100_s7 = inlined_call_operand.vmem [shape: bf16[8,32], index: 7, kind: input, shape index: {}]   ;;  %s1101_s8 = inlined_call_operand.<no memory space> [shape: f32[1,1], index: 8, kind: input, shape index: {}]   ;;  %s1102_s9 = inlined_call_operand.hbm [shape: f32[1,1,8], index: 9, kind: output, shape index: {}]  }
   0x1   :  { %v14_v0 = vstv %s1101_s8 }
   0x2   :  { %15 = vst [vmem:[#allocation2] sm:$0x1] %v14_v0 }
   0x3   :  { %16 = vsyncpa [#allocation4], 0 }
   0x4   :  { %17 = vsyncpa [#allocation5], 0  ;;  %s953_s11 = smov [#allocation3]  }
   0x5   :  { %s29_s12 = sshll.u32 %s953_s11, 4  ;;  %s30_s12 = int_to_ptr.vmem [resolvable:$true] %s29_s12 }
   0x6   :  { %s917_s13 = scalar_lea.vmem %s30_s12, 4096  ;;  %p922_p1 = scmp.lt.s32.totalorder %s30_s12, %s30_s12 }
   0x7   :  { %p918_p0 = scmp.ne.s32.totalorder %s30_s12, %s917_s13  ;;  %p923_p2 = scmp.lt.s32.totalorder %s917_s13, %s917_s13 }
   0x9   :  { %p924_p3 = por %p923_p2, %p922_p1 }
   0xb   :  { %p925_p4 = pnand %p924_p3, %p918_p0 }
   0xd   :  { %928 = shalt.err (!%p925_p4)
}
   0xe   :  { %s954_s14 = smov 64   ;;  %s955_s15 = smov 4  }
   0xf   :  { %35 = dma.hbm_to_vmem [thread:$0]  %s1096_s3, 4096, %s30_s12, [#allocation4], %s954_s14, %s954_s14, %s955_s15  }
  0x10   :  { %949 = dma.done.wait [#allocation4], 4096  }
  0x11   :  { %950 = vsyncadd [#allocation4], 4294963200  ;;  %v956_v1 = vmov 0   ;;  %v863_v2 = vld [vmem:[%s1094_s1 + $0x4] ss:$16 sps:$4 sm:$0xff]   ;;  %vm97_vm0 = vcmask 130048   ;;  %v57_v40 = vlaneseq }
  0x12   :  { %133 = vmatprep.mubr.bf16.mxu1 %v956_v1  ;;  %862 = vset.pattern.permute.xlu0 %v956_v1  ;;  %v865_v3 = vld [vmem:[%s1094_s1] ss:$16 sps:$4 sm:$0xff]   ;;  %v866_v5 = vld [vmem:[%s1094_s1 + $0x8] ss:$16 sps:$4 sm:$0xff]   ;;  %v868_v6 = vld [vmem:[%s1094_s1 + $0xc] ss:$16 sps:$4 sm:$0xff]  }
  0x13   :  { %v50_v4 = vld [vmem:[%s1093_s0] sm:$0xf]  ;;  %115 = vmatprep.subr.bf16.mxu1 %v863_v2  ;;  %v871_v9 = vld [vmem:[#allocation3 + $0x70] sm:$0xff]   ;;  %v873_v11 = vld [vmem:[#allocation3 + $0x68] sm:$0xff]   ;;  %v957_v39 = vmov 0.0   ;;  %v1035_v41 = vshrl.u32 %v57_v40, 7 }
  0x14   :  { %116 = vmatpush1.bf16.msra.mxu1 %v865_v3  ;;  %v869_v7 = vld [vmem:[#allocation3 + $0x78] sm:$0xff]   ;;  %v872_v10 = vld [vmem:[#allocation3 + $0x30] sm:$0xff]   ;;  %v875_v13 = vld [vmem:[#allocation3 + $0x28] sm:$0xff]   ;;  %vm958_vm1 = vmmov 0   ;;  %vm650_vm2 = vcmask 261120   ;;  %vm708_vm3 = vcmask 57344  }
  0x15   :  { %156 = vmatprep.subr.bf16.mxu1 %v868_v6  ;;  %v870_v8 = vld [vmem:[#allocation3 + $0x38] sm:$0xff]   ;;  %774 = vmatprep.subr.bf16.mxu0 %v869_v7  ;;  %v877_v15 = vld [vmem:[#allocation3 + $0x60] sm:$0xff]   ;;  %v878_v16 = vld [vmem:[#allocation3 + $0xf0] sm:$0xff]   ;;  %v59_v42 = vsub.s32 0, %v1035_v41  ;;  %v63_v44 = vsub.s32 1, %v1035_v41  ;;  %v67_v49 = vsub.s32 2, %v1035_v41 }
  0x16   :  { %775 = vmatpush3.bf16.msra.mxu0 %v870_v8  ;;  %v874_v12 = vld [vmem:[#allocation3 + $0xf8] sm:$0xff]   ;;  %v879_v17 = vld [vmem:[#allocation3 + $0x20] sm:$0xff]   ;;  %v880_v18 = vld [vmem:[#allocation3 + $0xb0] sm:$0xff]   ;;  %v71_v52 = vsub.s32 3, %v1035_v41 }
  0x17   :  { %729 = vmatmul.mubr.msk.bf16.vlgmr.msra.gmra.mxu1 %vm97_vm0, %v50_v4  ;;  %776 = vmatprep.subr.bf16.mxu0 %v871_v9  ;;  %v876_v14 = vld [vmem:[#allocation3 + $0xb8] sm:$0xff]   ;;  %v882_v20 = vld [vmem:[#allocation3 + $0xe8] sm:$0xff]   ;;  %v885_v23 = vld [vmem:[#allocation3 + $0x50] sm:$0xff]  }
  0x18   :  { %157 = vmatpush1.bf16.msra.mxu1 %v866_v5  ;;  %174 = vmatprep.mubr.bf16.mxu1 %v956_v1  ;;  %v881_v19 = vld [vmem:[#allocation3 + $0x58] sm:$0xff]   ;;  %v884_v22 = vld [vmem:[#allocation3 + $0xa8] sm:$0xff]   ;;  %v886_v24 = vld [vmem:[#allocation3 + $0xe0] sm:$0xff]  }
  0x19   :  { %796 = vmatprep.subr.bf16.mxu1 %v874_v12  ;;  %v883_v21 = vld [vmem:[#allocation3 + $0x18] sm:$0xff]   ;;  %v887_v25 = vld [vmem:[#allocation3 + $0x10] sm:$0xff]   ;;  %v888_v26 = vld [vmem:[#allocation3 + $0xa0] sm:$0xff]  }
  0x1a   :  { %777 = vmatpush3.bf16.msra.mxu0 %v872_v10  ;;  %v889_v27 = vld [vmem:[#allocation3 + $0x48] sm:$0xff]   ;;  %v890_v28 = vld [vmem:[#allocation3 + $0xd8] sm:$0xff]   ;;  %v893_v31 = vld [vmem:[#allocation3 + $0x40] sm:$0xff]  }
  0x1b   :  { %778 = vmatprep.subr.bf16.mxu0 %v873_v11  ;;  %v891_v29 = vld [vmem:[#allocation3 + $0x8] sm:$0xff]   ;;  %v892_v30 = vld [vmem:[#allocation3 + $0x98] sm:$0xff]   ;;  %v894_v32 = vld [vmem:[#allocation3 + $0xd0] sm:$0xff]  }
  0x1c   :  { %v895_v33 = vld [vmem:[#allocation3] sm:$0xff]   ;;  %v896_v34 = vld [vmem:[#allocation3 + $0x90] sm:$0xff]   ;;  %v897_v35 = vld [vmem:[#allocation3 + $0xc8] sm:$0xff]  }
  0x1d   :  { %v898_v36 = vld [vmem:[#allocation3 + $0x88] sm:$0xff]   ;;  %v899_v37 = vld [vmem:[#allocation3 + $0xc0] sm:$0xff]   ;;  %v901_v60 = vld [vmem:[%s1098_s5 + $0x38] sm:$0xff]  }
  0x1e   :  { %779 = vmatpush3.bf16.msra.mxu0 %v875_v13  ;;  %v900_v38 = vld [vmem:[#allocation3 + $0x80] sm:$0xff]   ;;  %v902_v2 = vld [vmem:[%s1098_s5 + $0x30] sm:$0xff]   ;;  %v905_v11 = vld [vmem:[%s1098_s5 + $0x18] sm:$0xff]  }
  0x1f   :  { %730 = vmatmul.mubr.msk.bf16.vlgmr.msra.gmra.mxu1 %vm97_vm0, %v50_v4  ;;  %780 = vmatprep.subr.bf16.mxu0 %v877_v15  ;;  %v55_v43 = vld [vmem:[%s1095_s2] sm:$0xf]  ;;  %v903_v8 = vld [vmem:[%s1098_s5 + $0x28] sm:$0xff]   ;;  %v906_v12 = vld [vmem:[%s1098_s5 + $0x10] sm:$0xff]  }
  0x20   :  { %797 = vmatpush3.bf16.msra.mxu1 %v876_v14  ;;  %v60_v45 = vrot.slane %v55_v43, %v59_v42  ;;  %v64_v46 = vrot.slane %v55_v43, %v63_v44  ;;  %v68_v55 = vrot.slane %v55_v43, %v67_v49  ;;  %v72_v59 = vrot.slane %v55_v43, %v71_v52  ;;  %v904_v10 = vld [vmem:[%s1098_s5 + $0x20] sm:$0xff]   ;;  %v907_v13 = vld [vmem:[%s1098_s5 + $0x8] sm:$0xff]  }
  0x21   :  { %798 = vmatprep.subr.bf16.mxu1 %v878_v16  ;;  %v908_v14 = vld [vmem:[%s1098_s5] sm:$0xff]  }
  0x22   :  { %781 = vmatpush3.bf16.msra.mxu0 %v879_v17  ;;  %v649_v40 = vld [vmem:[%s1100_s7] sm:$0xf] }
  0x23   :  { %782 = vmatprep.subr.bf16.mxu0 %v881_v19 }
  0x24   :  { %799 = vmatpush3.bf16.msra.mxu1 %v880_v18 }
  0x25   :  { %800 = vmatprep.subr.bf16.mxu1 %v882_v20  ;;  %v731_v20 = vld [vmem:[%s1097_s4] ss:$0 sm:$0xff] }
  0x26   :  { %783 = vmatpush3.bf16.msra.mxu0 %v883_v21 }
  0x27   :  { %784 = vmatprep.subr.bf16.mxu0 %v885_v23 }
  0x28   :  { %801 = vmatpush3.bf16.msra.mxu1 %v884_v22 }
  0x29   :  { %802 = vmatprep.subr.bf16.mxu1 %v886_v24 }
  0x2a   :  { %785 = vmatpush3.bf16.msra.mxu0 %v887_v25 }
  0x2b   :  { %786 = vmatprep.subr.bf16.mxu0 %v889_v27 }
  0x2c   :  { %803 = vmatpush3.bf16.msra.mxu1 %v888_v26 }
  0x2d   :  { %804 = vmatprep.subr.bf16.mxu1 %v890_v28 }
  0x2e   :  { %787 = vmatpush3.bf16.msra.mxu0 %v891_v29 }
  0x2f   :  { %788 = vmatprep.subr.bf16.mxu0 %v893_v31  ;;  %v764_v31 = vld [vmem:[%s1099_s6] ss:$0 sm:$0xff]  ;;  %s959_s6 = smov [#allocation6]  }
  0x30   :  { %805 = vmatpush3.bf16.msra.mxu1 %v892_v30  ;;  %v697_v30 = vld [vmem:[#allocation2] sm:$0x1]  ;;  %s716_s23 = sshll.u32 %s959_s6, 4  ;;  %s717_s23 = int_to_ptr.vmem [resolvable:$true] %s716_s23 }
  0x31   :  { %806 = vmatprep.subr.bf16.mxu1 %v894_v32  ;;  %700 = vperm.xlu0 %862, %v697_v30   ;;  %s929_s3 = scalar_lea.vmem %s717_s23, 16  ;;  %s933_s24 = scalar_lea.vmem %s717_s23, 32 }
  0x32   :  { %789 = vmatpush3.bf16.msra.mxu0 %v895_v33  ;;  %p930_p5 = scmp.ne.s32.totalorder %s717_s23, %s929_s3  ;;  %p934_p6 = scmp.lt.s32.totalorder %s717_s23, %s717_s23 }
  0x33   :  { %829 = vmatprep.subr.bf16.mxu0 %v957_v39  ;;  %p935_p7 = scmp.lt.s32.totalorder %s933_s24, %s929_s3 }
  0x34   :  { %807 = vmatpush3.bf16.msra.mxu1 %v896_v34 }
  0x35   :  { %808 = vmatprep.subr.bf16.mxu1 %v897_v35  ;;  %p936_p8 = por %p935_p7, %p934_p6 }
  0x37   :  { %p937_p9 = pnand %p936_p8, %p930_p5 }
  0x38   :  { %809 = vmatpush3.bf16.msra.mxu1 %v898_v36 }
  0x39   :  { %810 = vmatprep.subr.bf16.mxu1 %v899_v37 }
  0x3c   :  { %811 = vmatpush3.bf16.msra.mxu1 %v900_v38 }
  0x3d   :  { %849 = vmatprep.subr.bf16.mxu1 %v957_v39 }
  0xac   :  { %v701_v43 = vpop.permute.xlu0 %700 }
  0xad   :  { %v706_v44 = vrot.slane %v701_v43, %v59_v42 }
  0xd7   :  { %v135_v47 = vpop.f32.mrf.mxu1 }
  0xd8   :  { %v136_v48 = vadd.f32 %v135_v47, %v60_v45 }
  0xd9   :  { %v137_v50 = vpop.f32.mrf.mxu1 }
  0xda   :  { %v138_v51 = vadd.f32 %v137_v50, %v64_v46  ;;  %v183_v53 = vmax.f32 %v136_v48, 0.0 }
  0xdb   :  { %v139_v54 = vpop.f32.mrf.mxu1 }
  0xdc   :  { %v184_v56 = vmax.f32 %v138_v51, 0.0  ;;  %v187_v61 = vpack.c.bf16 %v183_v53, %v183_v53 }
  0xdd   :  { %v140_v57 = vpop.f32.mrf.mxu1 }
  0xde   :  { %v188_v58 = vpack.c.bf16 %v184_v56, %v184_v56 }
  0xdf   :  { %v176_v62 = vpop.f32.mrf.mxu1 }
  0xe0   :  { %v177_v63 = vadd.f32 %v176_v62, %v68_v55  ;;  %486 = vmatprep.mubr.bf16.mxu0 %v188_v58 }
  0xe1   :  { %v178_v0 = vpop.f32.mrf.mxu1  ;;  %487 = vmatmul.mubr.bf16.vlgmr.msra.gmra.mxu0 %v187_v61 }
  0xe2   :  { %v179_v1 = vadd.f32 %v178_v0, %v72_v59  ;;  %830 = vmatpush3.bf16.msra.mxu0 %v901_v60  ;;  %v185_v3 = vmax.f32 %v177_v63, 0.0  ;;  %845 = vmatprep.mubr.msk.bf16.mxu0 %vm958_vm1, %v957_v39 }
  0xe3   :  { %v180_v4 = vpop.f32.mrf.mxu1  ;;  %831 = vmatprep.subr.bf16.mxu0 %v957_v39 }
  0xe4   :  { %v186_v5 = vmax.f32 %v179_v1, 0.0  ;;  %v189_v9 = vpack.c.bf16 %v185_v3, %v185_v3 }
  0xe5   :  { %v181_v6 = vpop.f32.mrf.mxu1 }
  0xe6   :  { %v190_v7 = vpack.c.bf16 %v186_v5, %v186_v5  ;;  %832 = vmatpush3.bf16.msra.mxu0 %v902_v2 }
  0xe7   :  { %833 = vmatprep.subr.bf16.mxu0 %v957_v39 }
  0xe8   :  { %526 = vmatprep.mubr.bf16.mxu1 %v190_v7 }
  0xe9   :  { %527 = vmatmul.mubr.bf16.vlgmr.msra.gmra.mxu1 %v189_v9 }
  0xea   :  { %834 = vmatpush3.bf16.msra.mxu0 %v903_v8  ;;  %851 = vmatprep.mubr.msk.bf16.mxu1 %vm958_vm1, %v957_v39 }
  0xeb   :  { %835 = vmatprep.subr.bf16.mxu0 %v957_v39 }
  0xee   :  { %836 = vmatpush3.bf16.msra.mxu0 %v904_v10 }
  0xef   :  { %837 = vmatprep.subr.bf16.mxu0 %v957_v39 }
  0xf2   :  { %838 = vmatpush3.bf16.msra.mxu0 %v905_v11 }
  0xf3   :  { %839 = vmatprep.subr.bf16.mxu0 %v957_v39 }
  0xf6   :  { %840 = vmatpush3.bf16.msra.mxu0 %v906_v12 }
  0xf7   :  { %841 = vmatprep.subr.bf16.mxu0 %v957_v39 }
  0xfa   :  { %842 = vmatpush3.bf16.msra.mxu0 %v907_v13 }
  0xfb   :  { %843 = vmatprep.subr.bf16.mxu0 %v957_v39 }
  0xfe   :  { %844 = vmatpush3.bf16.msra.mxu0 %v908_v14 }
 0x1a1   :  { %v790_v15 = vpop.f32.mrf.mxu0 }
 0x1a3   :  { %v791_v16 = vpop.f32.mrf.mxu0 }
 0x1a4   :  { %v792_v19 = vadd.f32 %v791_v16, %v790_v15 }
 0x1a5   :  { %v793_v17 = vpop.f32.mrf.mxu0 }
 0x1a6   :  { %v489_v23 = vadd.f32 %v792_v19, %v731_v20 }
 0x1a7   :  { %v794_v18 = vpop.f32.mrf.mxu0 }
 0x1a9   :  { %v812_v21 = vpop.f32.mrf.mxu1 }
 0x1ab   :  { %v813_v22 = vpop.f32.mrf.mxu1 }
 0x1ac   :  { %v814_v24 = vadd.f32 %v813_v22, %v812_v21 }
 0x1ad   :  { %v815_v25 = vpop.f32.mrf.mxu1 }
 0x1ae   :  { %v529_v26 = vadd.f32 %v814_v24, %v489_v23 }
 0x1af   :  { %v816_v27 = vpop.f32.mrf.mxu1 }
 0x1b0   :  { %v534_v28 = vmax.f32 %v529_v26, 0.0 }
 0x1b2   :  { %v535_v29 = vpack.c.bf16 %v534_v28, %v534_v28 }
 0x1b4   :  { %846 = vmatmul.mubr.bf16.vlgmr.msra.gmra.mxu0 %v535_v29 }
 0x274   :  { %v641_v32 = vpop.f32.mrf.mxu0 }
 0x275   :  { %v642_v33 = vadd.f32 %v764_v31, %v641_v32 }
 0x276   :  { %v847_v34 = vpop.f32.mrf.mxu0 }
 0x277   :  { %v647_v35 = vmax.f32 %v642_v33, 0.0 }
 0x278   :  { %v644_v36 = vpop.f32.mrf.mxu0 }
 0x279   :  { %v648_v37 = vpack.c.bf16 %v647_v35, %v647_v35 }
 0x27a   :  { %v848_v38 = vpop.f32.mrf.mxu0 }
 0x27b   :  { %v655_v39 = vsel %vm650_vm2, %v648_v37, 0 }
 0x27c   :  { %850 = vmatpush3.bf16.xpose.msra.mxu1 %v655_v39 }
 0x283   :  { %852 = vmatmul.mubr.msk.bf16.vlgmr.msra.gmra.mxu1 %vm650_vm2, %v649_v40 }
 0x343   :  { %v691_v45 = vpop.f32.mrf.mxu1 }
 0x344   :  { %v707_v46 = vadd.f32 %v706_v44, %v691_v45 }
 0x345   :  { %v853_v47 = vpop.f32.mrf.mxu1 }
 0x346   :  { %709 = vst.msk [vmem:[#allocation6] sm:$0x1] %vm708_vm3, %v707_v46 }
 0x347   :  { %v694_v48 = vpop.f32.mrf.mxu1 }
 0x348   :  { %940 = shalt.err (!%p937_p9)
}
 0x349   :  { %719 = dma.vmem_to_hbm [thread:$0]  %s717_s23, 16, %s1102_s9, [#allocation5]   ;;  %v854_v41 = vpop.f32.mrf.mxu1 }
 0x34a   :  { %951 = dma.done.wait [#allocation5], 16  }
 0x34b   :  { %952 = vsyncadd [#allocation5], 4294967280 }
 0x34c   :  { %723 = vsyncpa [#allocation4], 1 }
 0x34d   :  { %724 = vsyncpa [#allocation5], 1 }

</bundles_post_ra>
